<compile_context>
chip_gen: v6e
topology: v6e:2x2x1
jax: 0.10.0
libtpu: 0.0.40
codegen_flags: <defaults>
</compile_context>

<pallas_src>
import functools

import jax
import jax.numpy as jnp
from jax.experimental import pallas as pl
from jax.experimental.pallas import tpu as pltpu


_MAX_TB = 1024  # lane-axis batch tile cap; multiple of 256 (v6e/v7x 2x256 MXU)


def net_layer_dims(l, k, ratio, input_dim=6):
    """Replicates GenerateNet's layer sizes (including the int() truncation)."""
    dims = [input_dim, k]
    for i in range(l):
        dims.append(int(k * ratio ** (i + 1)))
    dims.append(4)
    return dims  # len == n_linear_layers + 1


def make_mlp_kernel(n_layers, mxu_dtype=jnp.bfloat16):
    """Fused MLP kernel, lane-dense layout.

    refs = (x_ref, w0, b0, w1, b1, ..., o_ref) with
      x_ref: [in_dim, tb]   (batch on the lane axis)
      w_i  : [out_i, in_i]  (PyTorch-native layout)
      b_i  : [out_i, 1]
      o_ref: [out_dim, tb]
    ReLU after every hidden linear except the last hidden one, which gets a
    Sigmoid (matching `lst[-1] = nn.Sigmoid()`); the final linear has no
    activation.
    """

    def kernel(*refs):
        x_ref = refs[0]
        o_ref = refs[-1]
        params = refs[1:-1]  # w0, b0, w1, b1, ...
        h = x_ref[...]  # f32 [feat, tb]
        for i in range(n_layers):
            w = params[2 * i][...]
            b = params[2 * i + 1][...]
            # bf16 MXU inputs, f32 accumulation; result stays lane-dense.
            h = jnp.dot(w.astype(mxu_dtype), h.astype(mxu_dtype),
                        preferred_element_type=jnp.float32) + b
            if i < n_layers - 2:
                h = jnp.maximum(h, 0.0)                        # ReLU (VPU)
            elif i == n_layers - 2:
                # Sigmoid = 1/(1+exp(-h)); exp + approx reciprocal -> EUP slot.
                h = pl.reciprocal(1.0 + jnp.exp(-h), approx=True)
            # else: final linear layer -> no activation
        o_ref[...] = h.astype(o_ref.dtype)

    return kernel


def init_params(key, dims):
    """PyTorch-style uniform(-1/sqrt(fan_in), +1/sqrt(fan_in)) init.
    Weights stored [out, in] (PyTorch-native), biases as [out, 1]."""
    params = []
    for in_d, out_d in zip(dims[:-1], dims[1:]):
        key, kw, kb = jax.random.split(key, 3)
        bound = 1.0 / float(in_d) ** 0.5
        w = jax.random.uniform(kw, (out_d, in_d), jnp.float32, -bound, bound)
        b = jax.random.uniform(kb, (out_d, 1), jnp.float32, -bound, bound)
        params.append((w, b))
    return params


@functools.partial(jax.jit, static_argnames=("tb",))
def _net_forward(x, params_flat, *, tb):
    """x: [B, in_dim] f32.  params_flat: flat tuple (w0, b0, w1, b1, ...)."""
    B, in_dim = x.shape
    n_layers = len(params_flat) // 2
    out_dim = params_flat[-2].shape[0]  # last weight is [out, in]

    # Present the input lane-dense: [in_dim, B] (layout plumbing done by XLA).
    xT = x.T

    # Grid over batch tiles on the lane axis; all parameters map to the same
    # block every grid step, so they stay resident in VMEM.
    x_spec = pl.BlockSpec((in_dim, tb), lambda i: (0, i))
    param_specs = [pl.BlockSpec(p.shape, lambda i: (0, 0)) for p in params_flat]
    out_spec = pl.BlockSpec((out_dim, tb), lambda i: (0, i))

    kernel = make_mlp_kernel(n_layers)

    outT = pl.pallas_call(
        kernel,
        out_shape=jax.ShapeDtypeStruct((out_dim, B), jnp.float32),
        grid_spec=pltpu.PrefetchScalarGridSpec(
            num_scalar_prefetch=0,
            grid=(pl.cdiv(B, tb),),
            in_specs=[x_spec] + param_specs,
            out_specs=out_spec,
        ),
        compiler_params=pltpu.CompilerParams(
            dimension_semantics=("parallel",)),  # megacore-shardable on v7x
    )(xT, *params_flat)
    return outT.T  # back to [B, out_dim]


def net_forward(x, params_flat, tb=None):
    B = x.shape[0]
    if tb is None:
        # Small B: a single full-extent tile (any B allowed by the block rule).
        # Large B: big lane-axis tiles (multiple of 256).  If B % tb != 0 the
        # ragged last tile reads garbage columns that are dropped on the output
        # write -- harmless since batch columns are independent in an MLP.
        tb = B if B <= _MAX_TB else _MAX_TB
    return _net_forward(x, tuple(params_flat), tb=tb)


def reference_forward(x, params):
    """Pure-JAX f32 reference of the PyTorch forward, for correctness checks."""
    n = len(params)
    h = x
    for i, (w, b) in enumerate(params):
        h = h @ w.T + b.reshape(1, -1)
        if i < n - 2:
            h = jnp.maximum(h, 0.0)
        elif i == n - 2:
            h = jax.nn.sigmoid(h)
    return h


if __name__ == "__main__":
    # Net(l=2, k=16, ratio=2): dims 6 -> 16 -> 32 -> 64 -> 4
    l, k, ratio = 2, 16, 2
    dims = net_layer_dims(l, k, ratio, input_dim=6)

    key = jax.random.PRNGKey(0)
    key, kx = jax.random.split(key)
    B = 512  # two 256-column tiles -> grid of 2 parallel steps (both v7x TCs)
    x = jax.random.normal(kx, (B, dims[0]), jnp.float32)

    params = init_params(key, dims)
    params_flat = tuple(p for wb in params for p in wb)

    out = jax.block_until_ready(net_forward(x, params_flat, tb=256))
    ref = reference_forward(x, params)
    assert out.shape == (B, 4)
    # bf16 MXU inputs + approx-reciprocal sigmoid => loosened tolerance vs the
    # full-f32 reference.
    assert jnp.allclose(out, ref, atol=5e-2, rtol=5e-2), "mismatch vs reference"

    # Small-batch path: single full-extent tile (tb == B), exercises the
    # non-multiple-of-128 lane count.
    xs = x[:48]
    outs = jax.block_until_ready(net_forward(xs, params_flat))
    refs = reference_forward(xs, params)
    assert outs.shape == (48, 4)
    assert jnp.allclose(outs, refs, atol=5e-2, rtol=5e-2), "mismatch (small B)"

    print("KERNEL_OK")
</pallas_src>

<mosaic_0001>
module attributes {stable_mosaic.version = 11 : i64} {
  func.func @kernel(%arg0: i32, %arg1: memref<6x256xf32, #tpu.memory_space<vmem>>, %arg2: memref<16x6xf32, #tpu.memory_space<vmem>>, %arg3: memref<16x1xf32, #tpu.memory_space<vmem>>, %arg4: memref<32x16xf32, #tpu.memory_space<vmem>>, %arg5: memref<32x1xf32, #tpu.memory_space<vmem>>, %arg6: memref<64x32xf32, #tpu.memory_space<vmem>>, %arg7: memref<64x1xf32, #tpu.memory_space<vmem>>, %arg8: memref<4x64xf32, #tpu.memory_space<vmem>>, %arg9: memref<4x1xf32, #tpu.memory_space<vmem>>, %arg10: memref<4x256xf32, #tpu.memory_space<vmem>>) attributes {dimension_semantics = [#tpu.dimension_semantics<parallel>], iteration_bounds = array<i64: 2>, scalar_prefetch = 0 : i64, scratch_operands = 0 : i64, tpu.core_type = #tpu.core_type<tc>, window_params = [{transform_indices = @transform_0, window_bounds = array<i64: 6, 256>}, {pipeline_mode = #tpu.pipeline_mode<synchronous>, transform_indices = @transform_1, window_bounds = array<i64: 16, 6>}, {pipeline_mode = #tpu.pipeline_mode<synchronous>, transform_indices = @transform_2, window_bounds = array<i64: 16, 1>}, {pipeline_mode = #tpu.pipeline_mode<synchronous>, transform_indices = @transform_3, window_bounds = array<i64: 32, 16>}, {pipeline_mode = #tpu.pipeline_mode<synchronous>, transform_indices = @transform_4, window_bounds = array<i64: 32, 1>}, {pipeline_mode = #tpu.pipeline_mode<synchronous>, transform_indices = @transform_5, window_bounds = array<i64: 64, 32>}, {pipeline_mode = #tpu.pipeline_mode<synchronous>, transform_indices = @transform_6, window_bounds = array<i64: 64, 1>}, {pipeline_mode = #tpu.pipeline_mode<synchronous>, transform_indices = @transform_7, window_bounds = array<i64: 4, 64>}, {pipeline_mode = #tpu.pipeline_mode<synchronous>, transform_indices = @transform_8, window_bounds = array<i64: 4, 1>}, {transform_indices = @transform_9, window_bounds = array<i64: 4, 256>}]} {
    %c0 = arith.constant 0 : index
    %c0_0 = arith.constant 0 : index
    %0 = vector.load %arg1[%c0, %c0_0] : memref<6x256xf32, #tpu.memory_space<vmem>>, vector<6x256xf32>
    %c0_1 = arith.constant 0 : index
    %c0_2 = arith.constant 0 : index
    %1 = vector.load %arg2[%c0_1, %c0_2] : memref<16x6xf32, #tpu.memory_space<vmem>>, vector<16x6xf32>
    %c0_3 = arith.constant 0 : index
    %c0_4 = arith.constant 0 : index
    %2 = vector.load %arg3[%c0_3, %c0_4] : memref<16x1xf32, #tpu.memory_space<vmem>>, vector<16x1xf32>
    %3 = arith.truncf %1 : vector<16x6xf32> to vector<16x6xbf16>
    %4 = arith.truncf %0 : vector<6x256xf32> to vector<6x256xbf16>
    %cst = arith.constant dense<0.000000e+00> : vector<16x256xf32>
    %5 = tpu.matmul %3, %4, %cst {dimension_numbers = #tpu.dot_dimension_numbers<[1], [0], [0], [1], [0, 0, 1, 1], [], []>} : vector<16x6xbf16>, vector<6x256xbf16>, vector<16x256xf32> -> vector<16x256xf32>
    %6 = vector.broadcast %2 : vector<16x1xf32> to vector<16x256xf32>
    %7 = arith.addf %5, %6 : vector<16x256xf32>
    %cst_5 = arith.constant 0.000000e+00 : f32
    %8 = vector.broadcast %cst_5 : f32 to vector<16x256xf32>
    %9 = arith.maximumf %7, %8 : vector<16x256xf32>
    %c0_6 = arith.constant 0 : index
    %c0_7 = arith.constant 0 : index
    %10 = vector.load %arg4[%c0_6, %c0_7] : memref<32x16xf32, #tpu.memory_space<vmem>>, vector<32x16xf32>
    %c0_8 = arith.constant 0 : index
    %c0_9 = arith.constant 0 : index
    %11 = vector.load %arg5[%c0_8, %c0_9] : memref<32x1xf32, #tpu.memory_space<vmem>>, vector<32x1xf32>
    %12 = arith.truncf %10 : vector<32x16xf32> to vector<32x16xbf16>
    %13 = arith.truncf %9 : vector<16x256xf32> to vector<16x256xbf16>
    %cst_10 = arith.constant dense<0.000000e+00> : vector<32x256xf32>
    %14 = tpu.matmul %12, %13, %cst_10 {dimension_numbers = #tpu.dot_dimension_numbers<[1], [0], [0], [1], [0, 0, 1, 1], [], []>} : vector<32x16xbf16>, vector<16x256xbf16>, vector<32x256xf32> -> vector<32x256xf32>
    %15 = vector.broadcast %11 : vector<32x1xf32> to vector<32x256xf32>
    %16 = arith.addf %14, %15 : vector<32x256xf32>
    %cst_11 = arith.constant 0.000000e+00 : f32
    %17 = vector.broadcast %cst_11 : f32 to vector<32x256xf32>
    %18 = arith.maximumf %16, %17 : vector<32x256xf32>
    %c0_12 = arith.constant 0 : index
    %c0_13 = arith.constant 0 : index
    %19 = vector.load %arg6[%c0_12, %c0_13] : memref<64x32xf32, #tpu.memory_space<vmem>>, vector<64x32xf32>
    %c0_14 = arith.constant 0 : index
    %c0_15 = arith.constant 0 : index
    %20 = vector.load %arg7[%c0_14, %c0_15] : memref<64x1xf32, #tpu.memory_space<vmem>>, vector<64x1xf32>
    %21 = arith.truncf %19 : vector<64x32xf32> to vector<64x32xbf16>
    %22 = arith.truncf %18 : vector<32x256xf32> to vector<32x256xbf16>
    %cst_16 = arith.constant dense<0.000000e+00> : vector<64x256xf32>
    %23 = tpu.matmul %21, %22, %cst_16 {dimension_numbers = #tpu.dot_dimension_numbers<[1], [0], [0], [1], [0, 0, 1, 1], [], []>} : vector<64x32xbf16>, vector<32x256xbf16>, vector<64x256xf32> -> vector<64x256xf32>
    %24 = vector.broadcast %20 : vector<64x1xf32> to vector<64x256xf32>
    %25 = arith.addf %23, %24 : vector<64x256xf32>
    %cst_17 = arith.constant 0.000000e+00 : f32
    %26 = vector.broadcast %cst_17 : f32 to vector<64x256xf32>
    %27 = arith.subf %26, %25 : vector<64x256xf32>
    %28 = math.exp %27 : vector<64x256xf32>
    %cst_18 = arith.constant 1.000000e+00 : f32
    %29 = vector.broadcast %cst_18 : f32 to vector<64x256xf32>
    %30 = arith.addf %29, %28 : vector<64x256xf32>
    %31 = tpu.reciprocal %30 {approx = true} : vector<64x256xf32> -> vector<64x256xf32>
    %c0_19 = arith.constant 0 : index
    %c0_20 = arith.constant 0 : index
    %32 = vector.load %arg8[%c0_19, %c0_20] : memref<4x64xf32, #tpu.memory_space<vmem>>, vector<4x64xf32>
    %c0_21 = arith.constant 0 : index
    %c0_22 = arith.constant 0 : index
    %33 = vector.load %arg9[%c0_21, %c0_22] : memref<4x1xf32, #tpu.memory_space<vmem>>, vector<4x1xf32>
    %34 = arith.truncf %32 : vector<4x64xf32> to vector<4x64xbf16>
    %35 = arith.truncf %31 : vector<64x256xf32> to vector<64x256xbf16>
    %cst_23 = arith.constant dense<0.000000e+00> : vector<4x256xf32>
    %36 = tpu.matmul %34, %35, %cst_23 {dimension_numbers = #tpu.dot_dimension_numbers<[1], [0], [0], [1], [0, 0, 1, 1], [], []>} : vector<4x64xbf16>, vector<64x256xbf16>, vector<4x256xf32> -> vector<4x256xf32>
    %37 = vector.broadcast %33 : vector<4x1xf32> to vector<4x256xf32>
    %38 = arith.addf %36, %37 : vector<4x256xf32>
    %c0_24 = arith.constant 0 : index
    %c0_25 = arith.constant 0 : index
    %39 = vector.load %arg10[%c0_24, %c0_25] : memref<4x256xf32, #tpu.memory_space<vmem>>, vector<4x256xf32>
    tpu.vector_store %arg10[%c0_24, %c0_25], %38 {strides = array<i32>} : memref<4x256xf32, #tpu.memory_space<vmem>>, vector<4x256xf32>,
    return
  }
  func.func @transform_0(%arg0: i32) -> (i32, i32) {
    %c0_i32 = arith.constant 0 : i32
    %c0_i32_0 = arith.constant 0 : i32
    return %c0_i32, %arg0 : i32, i32
  }
  func.func @transform_1(%arg0: i32) -> (i32, i32) {
    %c0_i32 = arith.constant 0 : i32
    %c0_i32_0 = arith.constant 0 : i32
    %c0_i32_1 = arith.constant 0 : i32
    return %c0_i32, %c0_i32_0 : i32, i32
  }
  func.func @transform_2(%arg0: i32) -> (i32, i32) {
    %c0_i32 = arith.constant 0 : i32
    %c0_i32_0 = arith.constant 0 : i32
    %c0_i32_1 = arith.constant 0 : i32
    return %c0_i32, %c0_i32_0 : i32, i32
  }
  func.func @transform_3(%arg0: i32) -> (i32, i32) {
    %c0_i32 = arith.constant 0 : i32
    %c0_i32_0 = arith.constant 0 : i32
    %c0_i32_1 = arith.constant 0 : i32
    return %c0_i32, %c0_i32_0 : i32, i32
  }
  func.func @transform_4(%arg0: i32) -> (i32, i32) {
    %c0_i32 = arith.constant 0 : i32
    %c0_i32_0 = arith.constant 0 : i32
    %c0_i32_1 = arith.constant 0 : i32
    return %c0_i32, %c0_i32_0 : i32, i32
  }
  func.func @transform_5(%arg0: i32) -> (i32, i32) {
    %c0_i32 = arith.constant 0 : i32
    %c0_i32_0 = arith.constant 0 : i32
    %c0_i32_1 = arith.constant 0 : i32
    return %c0_i32, %c0_i32_0 : i32, i32
  }
  func.func @transform_6(%arg0: i32) -> (i32, i32) {
    %c0_i32 = arith.constant 0 : i32
    %c0_i32_0 = arith.constant 0 : i32
    %c0_i32_1 = arith.constant 0 : i32
    return %c0_i32, %c0_i32_0 : i32, i32
  }
  func.func @transform_7(%arg0: i32) -> (i32, i32) {
    %c0_i32 = arith.constant 0 : i32
    %c0_i32_0 = arith.constant 0 : i32
    %c0_i32_1 = arith.constant 0 : i32
    return %c0_i32, %c0_i32_0 : i32, i32
  }
  func.func @transform_8(%arg0: i32) -> (i32, i32) {
    %c0_i32 = arith.constant 0 : i32
    %c0_i32_0 = arith.constant 0 : i32
    %c0_i32_1 = arith.constant 0 : i32
    return %c0_i32, %c0_i32_0 : i32, i32
  }
  func.func @transform_9(%arg0: i32) -> (i32, i32) {
    %c0_i32 = arith.constant 0 : i32
    %c0_i32_0 = arith.constant 0 : i32
    return %c0_i32, %arg0 : i32, i32
  }
}

</mosaic_0001>

<bundles_post_ra>
// kernel: _net_forward.1
= control target key start
LH: loop header
LB: loop body
LE: loop exit
PB: predicated region body
PF: predicated region fallthrough
CT: control target
= control target key end

     0   :  { %14 = vsyncpa [#allocation3], 0  ;;  %s1320_s0 = inlined_call_operand.vmem [shape: f32[6,512], index: 0, kind: input, shape index: {}]   ;;  %s1321_s1 = inlined_call_operand.vmem [shape: f32[16,6], index: 1, kind: input, shape index: {}]   ;;  %s1322_s2 = inlined_call_operand.vmem [shape: f32[16,1], index: 2, kind: input, shape index: {}]   ;;  %s1323_s3 = inlined_call_operand.vmem [shape: f32[32,16], index: 3, kind: input, shape index: {}]   ;;  %s1324_s4 = inlined_call_operand.vmem [shape: f32[32,1], index: 4, kind: input, shape index: {}]   ;;  %s1325_s5 = inlined_call_operand.vmem [shape: f32[64,32], index: 5, kind: input, shape index: {}]   ;;  %s1326_s6 = inlined_call_operand.vmem [shape: f32[64,1], index: 6, kind: input, shape index: {}]   ;;  %s1327_s7 = inlined_call_operand.vmem [shape: f32[4,64], index: 7, kind: input, shape index: {}]   ;;  %s1328_s8 = inlined_call_operand.vmem [shape: f32[4,1], index: 8, kind: input, shape index: {}]   ;;  %s1329_s9 = inlined_call_operand.hbm [shape: f32[4,512], index: 9, kind: output, shape index: {}]  }
   0x1   :  { %16 = vsyncpa [#allocation3 + $0x1], 0  ;;  %s1124_s30 = smov 0   ;;  %s1126_s10 = smov 0  }
   0x2   :  { %s1128_s11 = smov 0   ;;  %s1130_s12 = smov 0  }
   0x3 LB: > { %s1145_s13 = sadd.s32 4294967295, %s1070_s12   ;;  %s882_s14 = sadd.s32 4294967294, %s1070_s12   ;;  %s1070_s12 = sphi %s1130_s12, %s1335_s12   ;;  %s1066_s11 = sphi %s1128_s11, %s1334_s11   ;;  %s1062_s10 = sphi %s1126_s10, %s1333_s10   ;;  %s1058_s30 = sphi %s1124_s30, %s1332_s30  }
   0x4   : > { %s1149_s15 = sadd.s32 1, %s1070_s12   ;;  %s223_s16 = sadd.s32 1, %s1066_s11 }
   0x5   : > { %s220_s17 = ssub.s32 %s1070_s12, %s1149_s15  ;;  %p233_p0 = scmp.ne.s32.totalorder %s1066_s11, %s1062_s10 }
   0x6   : > { %p221_p1 = scmp.eq.s32.totalorder %s220_s17, 0  ;;  %p234_p2 = scmp.eq.s32.totalorder %s1145_s13, 1 }
   0x7   : > { %p239_p3 = scmp.ne.s32.totalorder %s1062_s10, %s1058_s30  ;;  %p240_p4 = scmp.eq.s32.totalorder %s882_s14, 1 }
   0x8   : > { %s1160_s18 = scalar_select %p221_p1, %s1066_s11, %s223_s16  }
   0x9   : > { %p1162_p5 = por %p234_p2, %p233_p0  ;;  %p1166_p6 = por %p240_p4, %p239_p3 }
   0xa   : > { %p885_p7 = scmp.ge.s32.totalorder %s1070_s12, 1  ;;  %p291_p8 = scmp.lt.s32.totalorder %s1070_s12, 3 }
   0xc   : > { %p292_p9 = pnand %p885_p7, %p291_p8 }
   0xd   : > { %s887_s21 = sshll.u32 (!%p292_p9), %s1145_s13, 1  ;;  %s903_s28 = sshll.u32 (!%p292_p9), %s1145_s13, 7 }
   0xe   : > { %295 = sbr.rel (%p292_p9) target bundleno = 948 (0x3b4), region = 56  ;;  %p328_p10 = scmp.lt.s32.totalorder (!%p292_p9), %s887_s21, 3 }
   0xf   : > { %s1285_s22 = scalar_lea.hbm (!%p292_p9), %s1329_s9, %s903_s28  ;;  %s1073_s13 = smov (!%p292_p9), [#allocation2]  }
  0x13   : > { %v1072_v0 = vmov 0   ;;  %v339_v1 = vld [vmem:[%s1322_s2] sm:$0xff]  ;;  %s1337_s21 = smov (!%p328_p10, %s887_s21), 3  ;;  %v340_v2 = vld [vmem:[%s1322_s2 + $0x8] sm:$0xff]  ;;  %vm358_vm0 = vcmask 1042432   ;;  %vm354_vm1 = vcmask 48128  }
  0x14   : > { %397 = vmatprep.mubr.bf16.mxu1 %v1072_v0  ;;  %944 = vset.pattern.permute.xlu0 %v1072_v0  ;;  %s888_s26 = sshll.u32 %s1337_s21, 3  ;;  %v337_v3 = vld [vmem:[%s1321_s1] sm:$0xff]  ;;  %v338_v4 = vld [vmem:[%s1321_s1 + $0x8] sm:$0xff]  ;;  %v526_v12 = vld [vmem:[%s1326_s6 + $0x30] sm:$0xff]  ;;  %vm444_vm2 = vcmask 130048   ;;  %vm576_vm3 = vcmask 261120  }
  0x15   : > { %346 = vperm.xlu0 %944, %v339_v1   ;;  %945 = vset.pattern.permute.xlu1 %v1072_v0  ;;  %s331_s29 = scalar_lea.vmem %s1320_s0, %s888_s26  ;;  %v416_v7 = vld [vmem:[%s1324_s4] sm:$0xff]  ;;  %v341_v11 = vpack.c.bf16 %v338_v4, %v337_v3  ;;  %v522_v14 = vld [vmem:[%s1326_s6 + $0x10] sm:$0xff]  ;;  %v419_v18 = vld [vmem:[%s1324_s4 + $0x18] sm:$0xff]  ;;  %vm758_vm4 = vcmask 523264   ;;  %s324_s26 = sand.u32 1, %s1062_s10  }
  0x16   : > { %621 = vmatprep.mubr.bf16.mxu0 %v1072_v0  ;;  %v336_v5 = vld [vmem:[%s331_s29 + $0x8] sm:$0x3f]  ;;  %v335_v6 = vld [vmem:[%s331_s29] sm:$0x3f]  ;;  %v418_v17 = vld [vmem:[%s1324_s4 + $0x10] sm:$0xff]  ;;  %s886_s27 = sshll.u32 %s324_s26, 3 }
  0x17   : > { %v343_v8 = vpack.c.bf16 %v336_v5, %v336_v5  ;;  %v342_v9 = vpack.c.bf16 %v335_v6, %v335_v6  ;;  %v524_v13 = vld [vmem:[%s1326_s6 + $0x20] sm:$0xff]  ;;  %436 = vperm.xlu1 %945, %v418_v17   ;;  %v417_v19 = vld [vmem:[%s1324_s4 + $0x8] sm:$0xff]  ;;  %v527_v20 = vld [vmem:[%s1326_s6 + $0x38] sm:$0xff]  ;;  %s326_s29 = scalar_lea.vmem [#allocation2], %s886_s27  ;;  %s809_s23 = scalar_lea.sflag [#allocation3], %s324_s26 }
  0x18   : > { %v520_v15 = vld [vmem:[%s1326_s6] sm:$0xff]  ;;  %v525_v21 = vld [vmem:[%s1326_s6 + $0x28] sm:$0xff]  ;;  %v523_v22 = vld [vmem:[%s1326_s6 + $0x18] sm:$0xff]  ;;  %s823_s14 = sshll.u32 %s326_s29, 4  ;;  %s1014_s21 = sshll.u32 %s1073_s13, 4  ;;  %s824_s14 = int_to_ptr.vmem [resolvable:$true] %s823_s14  ;;  %s1015_s21 = int_to_ptr.vmem [resolvable:$false] %s1014_s21 }
  0x19   : > { %351 = vperm.xlu0 %944, %v340_v2   ;;  %889 = vmatprep.subr.msk.bf16.mxu1 %vm358_vm0, %v343_v8  ;;  %v360_v10 = vsel %vm358_vm0, %v342_v9, 0  ;;  %v743_v16 = vld [vmem:[%s1328_s8] sm:$0xf]  ;;  %v521_v23 = vld [vmem:[%s1326_s6 + $0x8] sm:$0xff]  ;;  %v414_v43 = vld [vmem:[%s1323_s3 + $0x10] sm:$0xff]  ;;  %s1010_s24 = scalar_lea.vmem %s824_s14, 128  ;;  %p1017_p0 = scmp.lt.s32.totalorder %s824_s14, %s1015_s21 }
  0x1a   : > { %380 = vmatpush1.bf16.msra.mxu1 %v360_v10  ;;  %v412_v38 = vld [vmem:[%s1323_s3] sm:$0xff]  ;;  %v413_v39 = vld [vmem:[%s1323_s3 + $0x8] sm:$0xff]  ;;  %v415_v44 = vld [vmem:[%s1323_s3 + $0x18] sm:$0xff]  ;;  %p1011_p11 = scmp.ne.s32.totalorder %s824_s14, %s1010_s24  ;;  %s1016_s25 = scalar_lea.vmem %s1015_s21, 256 }
  0x1b   : > { %441 = vperm.xlu1 %945, %v419_v18   ;;  %v420_v42 = vpack.c.bf16 %v413_v39, %v412_v38  ;;  %v421_v45 = vpack.c.bf16 %v415_v44, %v414_v43  ;;  %v514_v18 = vld [vmem:[%s1325_s5 + $0x10] sm:$0xff]  ;;  %p1018_p1 = scmp.lt.s32.totalorder %s1016_s25, %s1010_s24 }
  0x1c   : > { %p1012_p12 = pnand %p1011_p11, %p1162_p5 }
  0x1d   : > { %426 = vperm.xlu0 %944, %v416_v7   ;;  %890 = vmatmul.mubr.msk.bf16.vlgmr.msra.gmra.mxu1 %vm354_vm1, %v341_v11  ;;  %p1019_p2 = por %p1018_p1, %p1017_p0 }
  0x1e   : > { %483 = vmatprep.mubr.bf16.mxu1 %v1072_v0  ;;  %p1013_p13 = pneg %p1012_p12 }
  0x1f   : > { %431 = vperm.xlu1 %945, %v417_v19   ;;  %v515_v19 = vld [vmem:[%s1325_s5 + $0x18] sm:$0xff] }
  0x20   : > { %p1020_p3 = pnand %p1019_p2, %p1013_p13 }
  0x21   : > { %568 = vperm.xlu0 %944, %v526_v12  }
  0x23   : > { %573 = vperm.xlu1 %945, %v527_v20   ;;  %v529_v20 = vpack.c.bf16 %v515_v19, %v514_v18 }
  0x25   : > { %558 = vperm.xlu0 %944, %v524_v13  }
  0x27   : > { %563 = vperm.xlu1 %945, %v525_v21   ;;  %v516_v21 = vld [vmem:[%s1325_s5 + $0x20] sm:$0xff] }
  0x29   : > { %548 = vperm.xlu0 %944, %v522_v14   ;;  %v512_v14 = vld [vmem:[%s1325_s5] sm:$0xff] }
  0x2b   : > { %553 = vperm.xlu1 %945, %v523_v22   ;;  %v517_v22 = vld [vmem:[%s1325_s5 + $0x28] sm:$0xff] }
  0x2d   : > { %538 = vperm.xlu0 %944, %v520_v15   ;;  %v513_v15 = vld [vmem:[%s1325_s5 + $0x8] sm:$0xff] }
  0x2e   : > { %v528_v17 = vpack.c.bf16 %v513_v15, %v512_v14 }
  0x2f   : > { %543 = vperm.xlu1 %945, %v521_v23   ;;  %v530_v23 = vpack.c.bf16 %v517_v22, %v516_v21 }
  0x31   : > { %755 = vperm.xlu0 %944, %v743_v16  }
  0x90   : > { %v347_v24 = vpop.permute.xlu0 %346 }
  0x92   : > { %v437_v46 = vpop.permute.xlu1 %436 }
  0x94   : > { %v352_v27 = vpop.permute.xlu0 %351 }
  0x96   : > { %v442_v50 = vpop.permute.xlu1 %441 }
  0x98   : > { %v427_v59 = vpop.permute.xlu0 %426 }
  0x9a   : > { %v432_v54 = vpop.permute.xlu1 %431 }
  0xdd   : > { %v399_v25 = vpop.f32.mrf.mxu1 }
  0xde   : > { %v400_v31 = vadd.f32 %v399_v25, %v347_v24  ;;  %v519_v25 = vld [vmem:[%s1325_s5 + $0x38] sm:$0xff] }
  0xdf   : > { %v401_v26 = vpop.f32.mrf.mxu1 }
  0xe0   : > { %v402_v29 = vadd.f32 %v401_v26, %v347_v24  ;;  %v408_v37 = vmax.f32 %v400_v31, 0.0  ;;  %v518_v24 = vld [vmem:[%s1325_s5 + $0x30] sm:$0xff]  ;;  %v574_v31 = vpop.permute.xlu1 %573 }
  0xe1   : > { %v403_v28 = vpop.f32.mrf.mxu1  ;;  %v531_v26 = vpack.c.bf16 %v519_v25, %v518_v24 }
  0xe2   : > { %v404_v30 = vadd.f32 %v403_v28, %v352_v27  ;;  %v409_v35 = vmax.f32 %v402_v29, 0.0 }
  0xe3   : > { %v405_v32 = vpop.f32.mrf.mxu1 }
  0xe4   : > { %v406_v33 = vadd.f32 %v405_v32, %v352_v27  ;;  %v410_v34 = vmax.f32 %v404_v30, 0.0  ;;  %v569_v32 = vpop.permute.xlu0 %568 }
  0xe6   : > { %v411_v36 = vmax.f32 %v406_v33, 0.0  ;;  %v422_v41 = vpack.c.bf16 %v410_v34, %v408_v37 }
  0xe8   : > { %v423_v40 = vpack.c.bf16 %v411_v36, %v409_v35  ;;  %v564_v35 = vpop.permute.xlu1 %563  ;;  %v559_v36 = vpop.permute.xlu0 %558 }
  0xea   : > { %465 = vmatprep.subr.bf16.mxu1 %v423_v40 }
  0xeb   : > { %466 = vmatpush1.bf16.msra.mxu1 %v422_v41 }
  0xec   : > { %v554_v40 = vpop.permute.xlu1 %553  ;;  %v549_v41 = vpop.permute.xlu0 %548 }
  0xee   : > { %891 = vmatmul.mubr.msk.bf16.vlgmr.msra.gmra.mxu1 %vm444_vm2, %v420_v42 }
  0xef   : > { %493 = vmatprep.mubr.bf16.mxu1 %v1072_v0 }
  0xf6   : > { %892 = vmatmul.mubr.msk.bf16.gmra.mxu1 %vm444_vm2, %v421_v45 }
  0xf7   : > { %794 = vmatprep.mubr.bf16.mxu1 %v1072_v0 }
 0x1ae   : > { %v485_v47 = vpop.f32.mrf.mxu1 }
 0x1af   : > { %v486_v6 = vadd.f32 %v485_v47, %v427_v59 }
 0x1b0   : > { %v487_v48 = vpop.f32.mrf.mxu1 }
 0x1b1   : > { %v488_v62 = vadd.f32 %v487_v48, %v427_v59  ;;  %v504_v13 = vmax.f32 %v486_v6, 0.0  ;;  %v544_v59 = vpop.permute.xlu1 %543 }
 0x1b2   : > { %v489_v49 = vpop.f32.mrf.mxu1 }
 0x1b3   : > { %v490_v1 = vadd.f32 %v489_v49, %v432_v54  ;;  %v505_v8 = vmax.f32 %v488_v62, 0.0 }
 0x1b4   : > { %v491_v51 = vpop.f32.mrf.mxu1 }
 0x1b5   : > { %v492_v56 = vadd.f32 %v491_v51, %v432_v54  ;;  %v506_v10 = vmax.f32 %v490_v1, 0.0 }
 0x1b6   : > { %v495_v52 = vpop.f32.mrf.mxu1 }
 0x1b7   : > { %v496_v60 = vadd.f32 %v495_v52, %v437_v46  ;;  %v507_v3 = vmax.f32 %v492_v56, 0.0  ;;  %v532_v16 = vpack.c.bf16 %v506_v10, %v504_v13 }
 0x1b8   : > { %v497_v53 = vpop.f32.mrf.mxu1 }
 0x1b9   : > { %v498_v57 = vadd.f32 %v497_v53, %v437_v46  ;;  %v508_v7 = vmax.f32 %v496_v60, 0.0  ;;  %v533_v12 = vpack.c.bf16 %v507_v3, %v505_v8  ;;  %v539_v53 = vpop.permute.xlu0 %538 }
 0x1ba   : > { %v499_v55 = vpop.f32.mrf.mxu1 }
 0x1bb   : > { %v500_v58 = vadd.f32 %v499_v55, %v442_v50  ;;  %v509_v4 = vmax.f32 %v498_v57, 0.0 }
 0x1bc   : > { %v501_v61 = vpop.f32.mrf.mxu1 }
 0x1bd   : > { %v502_v63 = vadd.f32 %v501_v61, %v442_v50  ;;  %v510_v2 = vmax.f32 %v500_v58, 0.0 }
 0x1bf   : > { %v511_v5 = vmax.f32 %v502_v63, 0.0  ;;  %v534_v11 = vpack.c.bf16 %v510_v2, %v508_v7 }
 0x1c1   : > { %v535_v9 = vpack.c.bf16 %v511_v5, %v509_v4 }
 0x1c3   : > { %601 = vmatprep.subr.bf16.mxu0 %v535_v9 }
 0x1c4   : > { %602 = vmatpush1.bf16.msra.mxu0 %v534_v11 }
 0x1c5   : > { %603 = vmatprep.subr.bf16.mxu0 %v533_v12 }
 0x1c8   : > { %604 = vmatpush1.bf16.msra.mxu0 %v532_v16 }
 0x1cb   : > { %893 = vmatmul.mubr.msk.bf16.vlgmr.msra.gmra.mxu0 %vm576_vm3, %v528_v17 }
 0x1cc   : > { %631 = vmatprep.mubr.bf16.mxu0 %v1072_v0 }
 0x1d3   : > { %894 = vmatmul.mubr.msk.bf16.gmra.mxu0 %vm576_vm3, %v529_v20 }
 0x1d4   : > { %641 = vmatprep.mubr.bf16.mxu0 %v1072_v0 }
 0x1db   : > { %895 = vmatmul.mubr.msk.bf16.gmra.mxu0 %vm576_vm3, %v530_v23 }
 0x1dc   : > { %651 = vmatprep.mubr.bf16.mxu0 %v1072_v0 }
 0x1e3   : > { %896 = vmatmul.mubr.msk.bf16.gmra.mxu0 %vm576_vm3, %v531_v26 }
 0x28b   : > { %v623_v27 = vpop.f32.mrf.mxu0 }
 0x28c   : > { %v624_v20 = vadd.f32 %v623_v27, %v539_v53 }
 0x28d   : > { %v625_v28 = vpop.f32.mrf.mxu0 }
 0x28e   : > { %v626_v56 = vadd.f32 %v625_v28, %v539_v53 }
 0x28f   : > { %v627_v29 = vpop.f32.mrf.mxu0 }
 0x290   : > { %v628_v2 = vadd.f32 %v627_v29, %v544_v59  ;;  %v663_v25 = vsub.f32 0.0, %v626_v56 }
 0x291   : > { %v629_v30 = vpop.f32.mrf.mxu0 }
 0x292   : > { %v630_v6 = vadd.f32 %v629_v30, %v544_v59  ;;  %v664_v28 = vsub.f32 0.0, %v628_v2 }
 0x293   : > { %v633_v33 = vpop.f32.mrf.mxu0 }
 0x294   : > { %v634_v7 = vadd.f32 %v633_v33, %v549_v41  ;;  %v665_v21 = vsub.f32 0.0, %v630_v6  ;;  %v680_v33 = vmul.f32 1.442695, %v663_v25  ;;  %v682_v27 = vmul.f32 1.442695, %v664_v28 }
 0x295   : > { %v635_v34 = vpop.f32.mrf.mxu0  ;;  %v742_v25 = vld [vmem:[%s1327_s7] sm:$0xf] }
 0x296   : > { %v636_v60 = vadd.f32 %v635_v34, %v549_v41  ;;  %v666_v22 = vsub.f32 0.0, %v634_v7  ;;  %v684_v30 = vmul.f32 1.442695, %v665_v21 }
 0x297   : > { %v637_v0 = vpop.f32.mrf.mxu0 }
 0x298   : > { %v638_v61 = vadd.f32 %v637_v0, %v554_v40  ;;  %v667_v14 = vsub.f32 0.0, %v636_v60 }
 0x299   : > { %v639_v37 = vpop.f32.mrf.mxu0 }
 0x29a   : > { %v640_v42 = vadd.f32 %v639_v37, %v554_v40  ;;  %v668_v15 = vsub.f32 0.0, %v638_v61  ;;  %v688_v26 = vmul.f32 1.442695, %v667_v14 }
 0x29b   : > { %v643_v38 = vpop.f32.mrf.mxu0 }
 0x29c   : > { %v669_v47 = vsub.f32 0.0, %v640_v42  ;;  %v644_v54 = vadd.f32 %v643_v38, %v559_v36  ;;  %v690_v29 = vmul.f32 1.442695, %v668_v15 }
 0x29d   : > { %v645_v39 = vpop.f32.mrf.mxu0 }
 0x29e   : > { %v646_v44 = vadd.f32 %v645_v39, %v559_v36  ;;  %v692_v62 = vmul.f32 1.442695, %v669_v47  ;;  %v670_v8 = vsub.f32 0.0, %v644_v54 }
 0x29f   : > { %v647_v43 = vpop.f32.mrf.mxu0 }
 0x2a0   : > { %v671_v49 = vsub.f32 0.0, %v646_v44  ;;  %v648_v50 = vadd.f32 %v647_v43, %v564_v35  ;;  %v694_v23 = vmul.f32 1.442695, %v670_v8 }
 0x2a1   : > { %v649_v45 = vpop.f32.mrf.mxu0 }
 0x2a2   : > { %v650_v46 = vadd.f32 %v649_v45, %v564_v35  ;;  %v696_v3 = vmul.f32 1.442695, %v671_v49  ;;  %v672_v4 = vsub.f32 0.0, %v648_v50 }
 0x2a3   : > { %v653_v48 = vpop.f32.mrf.mxu0 }
 0x2a4   : > { %v673_v51 = vsub.f32 0.0, %v650_v46  ;;  %v654_v52 = vadd.f32 %v653_v48, %v569_v32  ;;  %v698_v17 = vmul.f32 1.442695, %v672_v4 }
 0x2a5   : > { %v655_v55 = vpop.f32.mrf.mxu0 }
 0x2a6   : > { %v700_v57 = vmul.f32 1.442695, %v673_v51  ;;  %v674_v58 = vsub.f32 0.0, %v654_v52  ;;  %v656_v63 = vadd.f32 %v655_v55, %v569_v32  ;;  %v686_v32 = vmul.f32 1.442695, %v666_v22 }
 0x2a7   : > { %v657_v1 = vpop.f32.mrf.mxu0 }
 0x2a8   : > { %v658_v5 = vadd.f32 %v657_v1, %v574_v31  ;;  %v675_v9 = vsub.f32 0.0, %v656_v63  ;;  %946 = vpow2.f32 %v700_v57  ;;  %v702_v11 = vmul.f32 1.442695, %v674_v58 }
 0x2a9   : > { %v659_v10 = vpop.f32.mrf.mxu0  ;;  %948 = vpow2.f32 %v692_v62 }
 0x2aa   : > { %v676_v12 = vsub.f32 0.0, %v658_v5  ;;  %v660_v13 = vadd.f32 %v659_v10, %v574_v31  ;;  %v704_v16 = vmul.f32 1.442695, %v675_v9  ;;  %950 = vpow2.f32 %v696_v3 }
 0x2ab   : > { %v662_v31 = vsub.f32 0.0, %v624_v20 }
 0x2ac   : > { %v706_v18 = vmul.f32 1.442695, %v676_v12  ;;  %v677_v19 = vsub.f32 0.0, %v660_v13  ;;  %952 = vpow2.f32 %v704_v16 }
 0x2ad   : > { %954 = vpow2.f32 %v702_v11  ;;  %v678_v34 = vmul.f32 1.442695, %v662_v31  ;;  %v756_v31 = vpop.permute.xlu0 %755 }
 0x2ae   : > { %v708_v24 = vmul.f32 1.442695, %v677_v19  ;;  %956 = vpow2.f32 %v706_v18 }
 0x2af   : > { %958 = vpow2.f32 %v698_v17 }
 0x2b0   : > { %960 = vpow2.f32 %v708_v24 }
 0x2b1   : > { %962 = vpow2.f32 %v694_v23 }
 0x2b2   : > { %964 = vpow2.f32 %v688_v26 }
 0x2b3   : > { %966 = vpow2.f32 %v690_v29  ;;  %v744_v29 = vpack.c.bf16 %v742_v25, %v742_v25 }
 0x2b4   : > { %968 = vpow2.f32 %v684_v30 }
 0x2b5   : > { %970 = vpow2.f32 %v686_v32  ;;  %v947_v0 = vpop.eup %946 }
 0x2b6   : > { %972 = vpow2.f32 %v680_v33  ;;  %v949_v35 = vpop.eup %948  ;;  %v721_v38 = vadd.f32 1.0, %v947_v0 }
 0x2b7   : > { %974 = vpow2.f32 %v682_v27  ;;  %v951_v36 = vpop.eup %950  ;;  %v717_v52 = vadd.f32 1.0, %v949_v35 }
 0x2b8   : > { %976 = vpow2.f32 %v678_v34  ;;  %v719_v47 = vadd.f32 1.0, %v951_v36 }
 0x2b9   : > { %v953_v37 = vpop.eup %952  ;;  %978 = vrcp.f32 %v721_v38 }
 0x2ba   : > { %v955_v39 = vpop.eup %954  ;;  %v723_v40 = vadd.f32 1.0, %v953_v37 }
 0x2bb   : > { %v957_v41 = vpop.eup %956  ;;  %v722_v45 = vadd.f32 1.0, %v955_v39 }
 0x2bc   : > { %v959_v42 = vpop.eup %958  ;;  %v724_v43 = vadd.f32 1.0, %v957_v41  ;;  %980 = vrcp.f32 %v723_v40 }
 0x2bd   : > { %v961_v44 = vpop.eup %960  ;;  %v720_v50 = vadd.f32 1.0, %v959_v42 }
 0x2be   : > { %v963_v46 = vpop.eup %962  ;;  %v725_v48 = vadd.f32 1.0, %v961_v44  ;;  %982 = vrcp.f32 %v724_v43 }
 0x2bf   : > { %v965_v49 = vpop.eup %964  ;;  %v718_v54 = vadd.f32 1.0, %v963_v46 }
 0x2c0   : > { %v967_v51 = vpop.eup %966  ;;  %984 = vrcp.f32 %v725_v48  ;;  %v715_v56 = vadd.f32 1.0, %v965_v49 }
 0x2c1   : > { %v969_v53 = vpop.eup %968  ;;  %986 = vrcp.f32 %v722_v45  ;;  %v716_v58 = vadd.f32 1.0, %v967_v51 }
 0x2c2   : > { %v971_v55 = vpop.eup %970  ;;  %988 = vrcp.f32 %v719_v47  ;;  %v713_v60 = vadd.f32 1.0, %v969_v53 }
 0x2c3   : > { %v973_v57 = vpop.eup %972  ;;  %990 = vrcp.f32 %v720_v50  ;;  %v714_v61 = vadd.f32 1.0, %v971_v55 }
 0x2c4   : > { %v975_v59 = vpop.eup %974  ;;  %992 = vrcp.f32 %v717_v52  ;;  %v711_v63 = vadd.f32 1.0, %v973_v57 }
 0x2c5   : > { %994 = vrcp.f32 %v718_v54  ;;  %v977_v62 = vpop.eup %976  ;;  %v712_v1 = vadd.f32 1.0, %v975_v59 }
 0x2c6   : > { %996 = vrcp.f32 %v715_v56  ;;  %v710_v2 = vadd.f32 1.0, %v977_v62  ;;  %v979_v3 = vpop.eup %978 }
 0x2c7   : > { %998 = vrcp.f32 %v716_v58 }
 0x2c8   : > { %1000 = vrcp.f32 %v713_v60 }
 0x2c9   : > { %1002 = vrcp.f32 %v714_v61  ;;  %v981_v4 = vpop.eup %980 }
 0x2ca   : > { %1004 = vrcp.f32 %v711_v63 }
 0x2cb   : > { %1006 = vrcp.f32 %v712_v1  ;;  %v983_v5 = vpop.eup %982 }
 0x2cc   : > { %1008 = vrcp.f32 %v710_v2 }
 0x2cd   : > { %v985_v6 = vpop.eup %984 }
 0x2ce   : > { %v987_v7 = vpop.eup %986  ;;  %v752_v8 = vpack.c.bf16 %v985_v6, %v981_v4 }
 0x2cf   : > { %v989_v9 = vpop.eup %988  ;;  %v751_v10 = vpack.c.bf16 %v983_v5, %v987_v7 }
 0x2d0   : > { %v991_v11 = vpop.eup %990  ;;  %770 = vmatprep.subr.bf16.mxu1 %v752_v8  ;;  %v750_v12 = vpack.c.bf16 %v979_v3, %v989_v9 }
 0x2d1   : > { %v993_v13 = vpop.eup %992  ;;  %771 = vmatpush1.bf16.msra.mxu1 %v751_v10 }
 0x2d2   : > { %v995_v14 = vpop.eup %994  ;;  %772 = vmatprep.subr.bf16.mxu1 %v750_v12 }
 0x2d3   : > { %v997_v15 = vpop.eup %996  ;;  %v749_v16 = vpack.c.bf16 %v991_v11, %v995_v14 }
 0x2d4   : > { %v999_v17 = vpop.eup %998  ;;  %v748_v18 = vpack.c.bf16 %v993_v13, %v997_v15 }
 0x2d5   : > { %v1001_v19 = vpop.eup %1000  ;;  %773 = vmatpush1.bf16.msra.mxu1 %v749_v16 }
 0x2d6   : > { %v1003_v20 = vpop.eup %1002  ;;  %774 = vmatprep.subr.bf16.mxu1 %v748_v18 }
 0x2d7   : > { %v1005_v21 = vpop.eup %1004  ;;  %v747_v22 = vpack.c.bf16 %v999_v17, %v1003_v20 }
 0x2d8   : > { %v1007_v23 = vpop.eup %1006  ;;  %v746_v24 = vpack.c.bf16 %v1001_v19, %v1005_v21 }
 0x2d9   : > { %775 = vmatpush1.bf16.msra.mxu1 %v747_v22  ;;  %v1009_v26 = vpop.eup %1008 }
 0x2da   : > { %776 = vmatprep.subr.bf16.mxu1 %v746_v24  ;;  %v745_v28 = vpack.c.bf16 %v1007_v23, %v1009_v26 }
 0x2dd   : > { %777 = vmatpush1.bf16.msra.mxu1 %v745_v28 }
 0x2e0   : > { %897 = vmatmul.mubr.msk.bf16.vlgmr.msra.gmra.mxu1 %vm758_vm4, %v744_v29 }
 0x3a0   : > { %v796_v30 = vpop.f32.mrf.mxu1 }
 0x3a1   : > { %v797_v33 = vadd.f32 %v796_v30, %v756_v31 }
 0x3a2   : > { %v798_v32 = vpop.f32.mrf.mxu1 }
 0x3a3   : > { %v799_v27 = vadd.f32 %v798_v32, %v756_v31 }
 0x3a4   : > { %v800_v34 = vpop.f32.mrf.mxu1 }
 0x3a5   : > { %v805_v0 = vcombine.low %v797_v33, %v799_v27 }
 0x3a6   : > { %v801_v35 = vpop.f32.mrf.mxu1 }
 0x3a7   : > { %807 = vst [vmem:[%s326_s29] sm:$0xff] %v805_v0 }
 0x3a8   : > { %1023 = shalt.err (!%p1020_p3)
}
 0x3a9   : > { %s1024_s27 = scalar_lea.hbm %s1285_s22, 128  ;;  %s1028_s29 = scalar_lea.hbm %s1329_s9, 256 }
 0x3aa   : > { %p1025_p4 = scmp.ne.s32.totalorder %s1285_s22, %s1024_s27  ;;  %p1029_p9 = scmp.lt.s32.totalorder %s1285_s22, %s1329_s9 }
 0x3ab   : > { %p1030_p10 = scmp.lt.s32.totalorder %s1028_s29, %s1024_s27 }
 0x3ac   : > { %p1026_p7 = pnand %p1025_p4, %p1162_p5 }
 0x3ad   : > { %p1031_p11 = por %p1030_p10, %p1029_p9 }
 0x3ae   : > { %p1027_p8 = pneg %p1026_p7 }
 0x3b0   : > { %p1032_p12 = pnand %p1031_p11, %p1027_p8 }
 0x3b2   : > { %1035 = shalt.err (!%p1032_p12)
}
 0x3b3   : > { %904 = dma.vmem_to_hbm [thread:$0]  (%p1162_p5), %s824_s14, 128, %s1285_s22, %s809_s23  }
 0x3b4 PF: > { %p910_p13 = scmp.ge.s32.totalorder %s1070_s12, 2  ;;  %s835_s24 = sand.u32 1, %s1058_s30  }
 0x3b5   : > { %s836_s13 = scalar_lea.sflag [#allocation3], %s835_s24 }
 0x3b6   : > { %p907_p0 = pnand %p910_p13, %p1166_p6 }
 0x3b8   : > { %p908_p1 = pneg %p907_p0 }
 0x3ba   : > { %1053 = dma.done.wait (%p908_p1), %s836_s13, 128  }
 0x3bb   : > { %1055 = vsyncadd (%p908_p1), %s836_s13, 4294967168  ;;  %p19_p2 = scmp.ge.s32.totalorder %s1149_s15, 4   ;;  %s1332_s30 = smov %s1062_s10 }
 0x3bc   : > { %s1333_s10 = smov %s1066_s11  ;;  %s1334_s11 = smov %s1160_s18 }
 0x3bd   : > { %s1335_s12 = smov %s1149_s15  ;;  %21 = sbr.rel (!%p19_p2) target bundleno = 3 (0x3), region = 91 }
 0x3c2   :  { %841 = vsyncpa [#allocation3], 1 }
 0x3c3   :  { %843 = vsyncpa [#allocation3 + $0x1], 1 }

</bundles_post_ra>
